<compile_context>
chip_gen: v6e
topology: v6e:2x2x1
jax: 0.10.0
libtpu: 0.0.40
codegen_flags: <defaults>
</compile_context>

<pallas_src>
import jax
import jax.numpy as jnp
import numpy as np
from jax import lax
from jax.experimental import pallas as pl
from jax.experimental.pallas import tpu as pltpu

# ----------------------------- problem sizes -----------------------------
N = 2          # batch
C_IN = 4       # in_channels
L = 32         # sequence length
C1 = 8         # branch 1 output channels
C2 = (6, 8)    # branch 2 (bottleneck, output)
C3 = (6, 8)    # branch 3 (bottleneck, output)
C4 = 8         # branch 4 output channels
K2, P2 = 5, 2
K3, P3 = 23, 11
C_OUT = C1 + C2[1] + C3[1] + C4      # 32

# ----------------------------- kernel layout -----------------------------
GAP = 16                             # guard lanes per side (>= P3); N*(L+2*GAP) == 128
LW = L + 2 * GAP                     # 64 lanes per batch
LANES = N * LW                       # 128 (full vreg lane width)
CI_PAD = 8                           # input slab rows: x(4) | mask(1) | zeros(3)
MASK_ROW = C_IN                      # row 4: 1.0 on data lanes, 0.0 on guard lanes
N_MID = 16                           # hmid rows: h2[0:6] | ones[6] | 0[7] | h3[8:14] | 0[14:16]
NSHIFT = 2 * P3 + 1                  # 23 tap shifts


def _inception_kernel(xa_ref,        # (8, 128)   gapped input slab (+ mask row)
                      wa_ref,        # (24, 8)    fused first-stage 1x1 weights (bias folded)
                      w4_ref,        # (8, 8)     branch-4 1x1 weights (bias folded)
                      wt_ref,        # (23,16,16) per-shift tap weights (biases on s=0)
                      out_ref):      # (32, 128)  gapped output slab
    f32 = jnp.float32
    xa = xa_ref[...]                                                      # (8, 128)

    # ---- branches 1/2/3 first stage: one matmul, relu (bias via mask row) ----
    y1 = jnp.maximum(jnp.dot(wa_ref[...], xa, preferred_element_type=f32), 0.0)   # (24, 128)

    # ---- branch 4: avgpool(k=3,s=1,p=1, count_include_pad) then 1x1 conv ----
    # Guard lanes supply the pool's zero padding; the mask row is kept un-pooled so it can
    # carry the branch-4 bias through the matmul.
    pooled = (pltpu.roll(xa, 1, axis=1) + xa
              + pltpu.roll(xa, LANES - 1, axis=1)) * (1.0 / 3.0)          # (8, 128)
    row = lax.broadcasted_iota(jnp.int32, (CI_PAD, LANES), 0)
    p4op = jnp.where(row < C_IN, pooled, xa)                              # rows 0-3 pooled, 4 mask, 5-7 zero
    p4 = jnp.maximum(jnp.dot(w4_ref[...], p4op, preferred_element_type=f32), 0.0)  # (8, 128)

    # ---- branches 2/3 second stage: per-shift accumulate (no im2col slab) ----
    hmid = y1[C1:C1 + N_MID, :]                                           # (16, 128); guard lanes == 0
    acc = jnp.zeros((N_MID, LANES), f32)
    for s in range(-P3, P3 + 1):
        shifted = hmid if s == 0 else pltpu.roll(hmid, (-s) % LANES, axis=1)
        acc = acc + jnp.dot(wt_ref[s + P3], shifted, preferred_element_type=f32)
    p23 = jnp.maximum(acc, 0.0)                                           # rows 0-7 = p2, 8-15 = p3

    # ---- aligned, full-lane-width stores: [p1 | p2 | p3 | p4] ----
    out_ref[pl.ds(0, C1), :] = y1[0:C1, :]
    out_ref[pl.ds(C1, N_MID), :] = p23
    out_ref[pl.ds(C1 + N_MID, C4), :] = p4


@jax.jit
def inception_forward(x_ncl, params):
    """x_ncl: (N, C_IN, L) float32 in PyTorch NCL layout. Returns (N, C_OUT, L)."""
    wa, w4m, wt = params

    # Gapped, lane-dense input slab (layout plumbing only; all compute stays in the kernel).
    xp = jnp.pad(x_ncl, ((0, 0), (0, 0), (GAP, GAP)))                                # (N, 4, 64)
    mask = jnp.pad(jnp.ones((N, 1, L), jnp.float32), ((0, 0), (0, 0), (GAP, GAP)))   # (N, 1, 64)
    zrow = jnp.zeros((N, CI_PAD - C_IN - 1, LW), jnp.float32)                        # (N, 3, 64)
    slab = jnp.concatenate([xp, mask, zrow], axis=1)                                 # (N, 8, 64)
    slab = jnp.transpose(slab, (1, 0, 2)).reshape(CI_PAD, LANES)                     # (8, 128)

    out_g = pl.pallas_call(
        _inception_kernel,
        out_shape=jax.ShapeDtypeStruct((C_OUT, LANES), jnp.float32),
        in_specs=[pl.BlockSpec(memory_space=pltpu.MemorySpace.VMEM)] * 4,
        out_specs=pl.BlockSpec(memory_space=pltpu.MemorySpace.VMEM),
    )(slab, wa, w4m, wt)

    out = out_g.reshape(C_OUT, N, LW)[:, :, GAP:GAP + L]                             # (32, N, 32)
    return jnp.transpose(out, (1, 0, 2))                                             # (N, 32, 32)


# ----------------------------- parameter construction -----------------------------
def make_params(key):
    """Deterministic synthetic weights: kernel-layout fused params + PyTorch-layout params.
    All weight fusion happens HERE (once); the jitted forward is a single pallas_call."""
    keys = jax.random.split(key, 12)

    def norm(k, shape, scale=0.1):
        return scale * jax.random.normal(k, shape, dtype=jnp.float32)

    w1 = norm(keys[0], (C1, C_IN, 1));         b1 = norm(keys[1], (C1,))
    w2a = norm(keys[2], (C2[0], C_IN, 1));     b2a = norm(keys[3], (C2[0],))
    w2b = norm(keys[4], (C2[1], C2[0], K2));   b2b = norm(keys[5], (C2[1],))
    w3a = norm(keys[6], (C3[0], C_IN, 1));     b3a = norm(keys[7], (C3[0],))
    w3b = norm(keys[8], (C3[1], C3[0], K3));   b3b = norm(keys[9], (C3[1],))
    w4 = norm(keys[10], (C4, C_IN, 1));        b4 = norm(keys[11], (C4,))

    pt_params = (w1, b1, w2a, b2a, w2b, b2b, w3a, b3a, w3b, b3b, w4, b4)
    a = np.asarray

    # Fused first-stage weights: rows [p1:0-7 | h2:8-13 | ones:14 | 0:15 | h3:16-21 | 0:22-23],
    # columns [x channels 0-3 | mask row (carries the bias) | 0 0 0].
    wa = np.zeros((24, CI_PAD), np.float32)
    wa[0:C1, 0:C_IN] = a(w1)[:, :, 0];              wa[0:C1, MASK_ROW] = a(b1)
    wa[8:8 + C2[0], 0:C_IN] = a(w2a)[:, :, 0];      wa[8:8 + C2[0], MASK_ROW] = a(b2a)
    wa[14, MASK_ROW] = 1.0                          # ones-carrier row for the tap-conv biases
    wa[16:16 + C3[0], 0:C_IN] = a(w3a)[:, :, 0];    wa[16:16 + C3[0], MASK_ROW] = a(b3a)

    # Branch-4 1x1 weights with bias folded against the mask row.
    w4m = np.zeros((C4, CI_PAD), np.float32)
    w4m[:, 0:C_IN] = a(w4)[:, :, 0]
    w4m[:, MASK_ROW] = a(b4)

    # Per-shift tap weights, shifts s = -11..11.
    #   hmid columns: h2 ch 0-5, ones-carrier 6, zero 7, h3 ch 8-13, zero 14-15.
    #   W_s[o, c] = w[o, c, s + P]  (the p2 block is nonzero only for |s| <= 2).
    wt = np.zeros((NSHIFT, N_MID, N_MID), np.float32)
    w2b_n, w3b_n = a(w2b), a(w3b)
    for s in range(-P2, P2 + 1):
        wt[s + P3, 0:C2[1], 0:C2[0]] = w2b_n[:, :, s + P2]
    for s in range(-P3, P3 + 1):
        wt[s + P3, C2[1]:, 8:8 + C3[0]] = w3b_n[:, :, s + P3]
    wt[P3, 0:C2[1], 6] = a(b2b)                     # biases picked up by the s=0 tap
    wt[P3, C2[1]:, 6] = a(b3b)

    kernel_params = (jnp.asarray(wa), jnp.asarray(w4m), jnp.asarray(wt))
    return kernel_params, pt_params


# ----------------------------- pure-JAX reference -----------------------------
def _conv1d_ref(x, w_oik, b, pad):
    y = lax.conv_general_dilated(
        x, w_oik, window_strides=(1,), padding=[(pad, pad)],
        dimension_numbers=("NCH", "OIH", "NCH"),
        precision=lax.Precision.HIGHEST)
    return y + b[None, :, None]


def inception_reference(x, pt):
    (w1, b1, w2a, b2a, w2b, b2b, w3a, b3a, w3b, b3b, w4, b4) = pt
    p1 = jax.nn.relu(_conv1d_ref(x, w1, b1, 0))
    p2 = jax.nn.relu(_conv1d_ref(jax.nn.relu(_conv1d_ref(x, w2a, b2a, 0)), w2b, b2b, P2))
    p3 = jax.nn.relu(_conv1d_ref(jax.nn.relu(_conv1d_ref(x, w3a, b3a, 0)), w3b, b3b, P3))
    xp = jnp.pad(x, ((0, 0), (0, 0), (1, 1)))
    pooled = (xp[:, :, :-2] + xp[:, :, 1:-1] + xp[:, :, 2:]) / 3.0   # count_include_pad=True
    p4 = jax.nn.relu(_conv1d_ref(pooled, w4, b4, 0))
    return jnp.concatenate([p1, p2, p3, p4], axis=1)


if __name__ == "__main__":
    key = jax.random.PRNGKey(0)
    kx, kp = jax.random.split(key)
    x = jax.random.normal(kx, (N, C_IN, L), dtype=jnp.float32)   # PyTorch NCL layout

    kernel_params, pt_params = make_params(kp)

    out = jax.block_until_ready(inception_forward(x, kernel_params))
    ref = jax.block_until_ready(inception_reference(x, pt_params))

    assert out.shape == (N, C_OUT, L), out.shape
    np.testing.assert_allclose(np.asarray(out), np.asarray(ref), rtol=2e-3, atol=2e-3)
    print("KERNEL_OK")
</pallas_src>

<mosaic_0001>
module attributes {stable_mosaic.version = 11 : i64} {
  func.func @_inception_kernel(%arg0: memref<8x128xf32, #tpu.memory_space<vmem>>, %arg1: memref<24x8xf32, #tpu.memory_space<vmem>>, %arg2: memref<8x8xf32, #tpu.memory_space<vmem>>, %arg3: memref<23x16x16xf32, #tpu.memory_space<vmem>>, %arg4: memref<32x128xf32, #tpu.memory_space<vmem>>) attributes {dimension_semantics = [], scalar_prefetch = 0 : i64, scratch_operands = 0 : i64, tpu.core_type = #tpu.core_type<tc>} {
    %c0 = arith.constant 0 : index
    %c0_0 = arith.constant 0 : index
    %0 = vector.load %arg0[%c0, %c0_0] : memref<8x128xf32, #tpu.memory_space<vmem>>, vector<8x128xf32>
    %c0_1 = arith.constant 0 : index
    %c0_2 = arith.constant 0 : index
    %1 = vector.load %arg1[%c0_1, %c0_2] : memref<24x8xf32, #tpu.memory_space<vmem>>, vector<24x8xf32>
    %cst = arith.constant dense<0.000000e+00> : vector<24x128xf32>
    %2 = tpu.matmul %1, %0, %cst {dimension_numbers = #tpu.dot_dimension_numbers<[1], [0], [0], [1], [0, 0, 1, 1], [], []>} : vector<24x8xf32>, vector<8x128xf32>, vector<24x128xf32> -> vector<24x128xf32>
    %cst_3 = arith.constant 0.000000e+00 : f32
    %3 = vector.broadcast %cst_3 : f32 to vector<24x128xf32>
    %4 = arith.maximumf %2, %3 : vector<24x128xf32>
    %c1_i32 = arith.constant 1 : i32
    %5 = tpu.dynamic_rotate %0 by %c1_i32 dim 1 : vector<8x128xf32>, i32 -> vector<8x128xf32>
    %6 = arith.addf %5, %0 : vector<8x128xf32>
    %c127_i32 = arith.constant 127 : i32
    %7 = tpu.dynamic_rotate %0 by %c127_i32 dim 1 : vector<8x128xf32>, i32 -> vector<8x128xf32>
    %8 = arith.addf %6, %7 : vector<8x128xf32>
    %cst_4 = arith.constant 0.333333343 : f32
    %9 = vector.broadcast %cst_4 : f32 to vector<8x128xf32>
    %10 = arith.mulf %8, %9 : vector<8x128xf32>
    %11 = tpu.iota {dimensions = array<i32: 0>} : vector<8x128xi32>
    %c4_i32 = arith.constant 4 : i32
    %12 = vector.broadcast %c4_i32 : i32 to vector<8x128xi32>
    %13 = arith.cmpi slt, %11, %12 : vector<8x128xi32>
    %14 = arith.select %13, %10, %0 : vector<8x128xi1>, vector<8x128xf32>
    %c0_5 = arith.constant 0 : index
    %c0_6 = arith.constant 0 : index
    %15 = vector.load %arg2[%c0_5, %c0_6] : memref<8x8xf32, #tpu.memory_space<vmem>>, vector<8x8xf32>
    %cst_7 = arith.constant dense<0.000000e+00> : vector<8x128xf32>
    %16 = tpu.matmul %15, %14, %cst_7 {dimension_numbers = #tpu.dot_dimension_numbers<[1], [0], [0], [1], [0, 0, 1, 1], [], []>} : vector<8x8xf32>, vector<8x128xf32>, vector<8x128xf32> -> vector<8x128xf32>
    %cst_8 = arith.constant 0.000000e+00 : f32
    %17 = vector.broadcast %cst_8 : f32 to vector<8x128xf32>
    %18 = arith.maximumf %16, %17 : vector<8x128xf32>
    %19 = vector.extract_strided_slice %4 {offsets = [8, 0], sizes = [16, 128], strides = [1, 1]} : vector<24x128xf32> to vector<16x128xf32>
    %cst_9 = arith.constant 0.000000e+00 : f32
    %20 = vector.broadcast %cst_9 : f32 to vector<16x128xf32>
    %c11_i32 = arith.constant 11 : i32
    %21 = tpu.dynamic_rotate %19 by %c11_i32 dim 1 : vector<16x128xf32>, i32 -> vector<16x128xf32>
    %c0_10 = arith.constant 0 : index
    %c0_11 = arith.constant 0 : index
    %c0_12 = arith.constant 0 : index
    %22 = vector.load %arg3[%c0_10, %c0_11, %c0_12] : memref<23x16x16xf32, #tpu.memory_space<vmem>>, vector<1x16x16xf32>
    %23 = vector.shape_cast %22 : vector<1x16x16xf32> to vector<16x16xf32>
    %cst_13 = arith.constant dense<0.000000e+00> : vector<16x128xf32>
    %24 = tpu.matmul %23, %21, %cst_13 {dimension_numbers = #tpu.dot_dimension_numbers<[1], [0], [0], [1], [0, 0, 1, 1], [], []>} : vector<16x16xf32>, vector<16x128xf32>, vector<16x128xf32> -> vector<16x128xf32>
    %25 = arith.addf %20, %24 : vector<16x128xf32>
    %c10_i32 = arith.constant 10 : i32
    %26 = tpu.dynamic_rotate %19 by %c10_i32 dim 1 : vector<16x128xf32>, i32 -> vector<16x128xf32>
    %c1 = arith.constant 1 : index
    %c0_14 = arith.constant 0 : index
    %c0_15 = arith.constant 0 : index
    %27 = vector.load %arg3[%c1, %c0_14, %c0_15] : memref<23x16x16xf32, #tpu.memory_space<vmem>>, vector<1x16x16xf32>
    %28 = vector.shape_cast %27 : vector<1x16x16xf32> to vector<16x16xf32>
    %cst_16 = arith.constant dense<0.000000e+00> : vector<16x128xf32>
    %29 = tpu.matmul %28, %26, %cst_16 {dimension_numbers = #tpu.dot_dimension_numbers<[1], [0], [0], [1], [0, 0, 1, 1], [], []>} : vector<16x16xf32>, vector<16x128xf32>, vector<16x128xf32> -> vector<16x128xf32>
    %30 = arith.addf %25, %29 : vector<16x128xf32>
    %c9_i32 = arith.constant 9 : i32
    %31 = tpu.dynamic_rotate %19 by %c9_i32 dim 1 : vector<16x128xf32>, i32 -> vector<16x128xf32>
    %c2 = arith.constant 2 : index
    %c0_17 = arith.constant 0 : index
    %c0_18 = arith.constant 0 : index
    %32 = vector.load %arg3[%c2, %c0_17, %c0_18] : memref<23x16x16xf32, #tpu.memory_space<vmem>>, vector<1x16x16xf32>
    %33 = vector.shape_cast %32 : vector<1x16x16xf32> to vector<16x16xf32>
    %cst_19 = arith.constant dense<0.000000e+00> : vector<16x128xf32>
    %34 = tpu.matmul %33, %31, %cst_19 {dimension_numbers = #tpu.dot_dimension_numbers<[1], [0], [0], [1], [0, 0, 1, 1], [], []>} : vector<16x16xf32>, vector<16x128xf32>, vector<16x128xf32> -> vector<16x128xf32>
    %35 = arith.addf %30, %34 : vector<16x128xf32>
    %c8_i32 = arith.constant 8 : i32
    %36 = tpu.dynamic_rotate %19 by %c8_i32 dim 1 : vector<16x128xf32>, i32 -> vector<16x128xf32>
    %c3 = arith.constant 3 : index
    %c0_20 = arith.constant 0 : index
    %c0_21 = arith.constant 0 : index
    %37 = vector.load %arg3[%c3, %c0_20, %c0_21] : memref<23x16x16xf32, #tpu.memory_space<vmem>>, vector<1x16x16xf32>
    %38 = vector.shape_cast %37 : vector<1x16x16xf32> to vector<16x16xf32>
    %cst_22 = arith.constant dense<0.000000e+00> : vector<16x128xf32>
    %39 = tpu.matmul %38, %36, %cst_22 {dimension_numbers = #tpu.dot_dimension_numbers<[1], [0], [0], [1], [0, 0, 1, 1], [], []>} : vector<16x16xf32>, vector<16x128xf32>, vector<16x128xf32> -> vector<16x128xf32>
    %40 = arith.addf %35, %39 : vector<16x128xf32>
    %c7_i32 = arith.constant 7 : i32
    %41 = tpu.dynamic_rotate %19 by %c7_i32 dim 1 : vector<16x128xf32>, i32 -> vector<16x128xf32>
    %c4 = arith.constant 4 : index
    %c0_23 = arith.constant 0 : index
    %c0_24 = arith.constant 0 : index
    %42 = vector.load %arg3[%c4, %c0_23, %c0_24] : memref<23x16x16xf32, #tpu.memory_space<vmem>>, vector<1x16x16xf32>
    %43 = vector.shape_cast %42 : vector<1x16x16xf32> to vector<16x16xf32>
    %cst_25 = arith.constant dense<0.000000e+00> : vector<16x128xf32>
    %44 = tpu.matmul %43, %41, %cst_25 {dimension_numbers = #tpu.dot_dimension_numbers<[1], [0], [0], [1], [0, 0, 1, 1], [], []>} : vector<16x16xf32>, vector<16x128xf32>, vector<16x128xf32> -> vector<16x128xf32>
    %45 = arith.addf %40, %44 : vector<16x128xf32>
    %c6_i32 = arith.constant 6 : i32
    %46 = tpu.dynamic_rotate %19 by %c6_i32 dim 1 : vector<16x128xf32>, i32 -> vector<16x128xf32>
    %c5 = arith.constant 5 : index
    %c0_26 = arith.constant 0 : index
    %c0_27 = arith.constant 0 : index
    %47 = vector.load %arg3[%c5, %c0_26, %c0_27] : memref<23x16x16xf32, #tpu.memory_space<vmem>>, vector<1x16x16xf32>
    %48 = vector.shape_cast %47 : vector<1x16x16xf32> to vector<16x16xf32>
    %cst_28 = arith.constant dense<0.000000e+00> : vector<16x128xf32>
    %49 = tpu.matmul %48, %46, %cst_28 {dimension_numbers = #tpu.dot_dimension_numbers<[1], [0], [0], [1], [0, 0, 1, 1], [], []>} : vector<16x16xf32>, vector<16x128xf32>, vector<16x128xf32> -> vector<16x128xf32>
    %50 = arith.addf %45, %49 : vector<16x128xf32>
    %c5_i32 = arith.constant 5 : i32
    %51 = tpu.dynamic_rotate %19 by %c5_i32 dim 1 : vector<16x128xf32>, i32 -> vector<16x128xf32>
    %c6 = arith.constant 6 : index
    %c0_29 = arith.constant 0 : index
    %c0_30 = arith.constant 0 : index
    %52 = vector.load %arg3[%c6, %c0_29, %c0_30] : memref<23x16x16xf32, #tpu.memory_space<vmem>>, vector<1x16x16xf32>
    %53 = vector.shape_cast %52 : vector<1x16x16xf32> to vector<16x16xf32>
    %cst_31 = arith.constant dense<0.000000e+00> : vector<16x128xf32>
    %54 = tpu.matmul %53, %51, %cst_31 {dimension_numbers = #tpu.dot_dimension_numbers<[1], [0], [0], [1], [0, 0, 1, 1], [], []>} : vector<16x16xf32>, vector<16x128xf32>, vector<16x128xf32> -> vector<16x128xf32>
    %55 = arith.addf %50, %54 : vector<16x128xf32>
    %c4_i32_32 = arith.constant 4 : i32
    %56 = tpu.dynamic_rotate %19 by %c4_i32_32 dim 1 : vector<16x128xf32>, i32 -> vector<16x128xf32>
    %c7 = arith.constant 7 : index
    %c0_33 = arith.constant 0 : index
    %c0_34 = arith.constant 0 : index
    %57 = vector.load %arg3[%c7, %c0_33, %c0_34] : memref<23x16x16xf32, #tpu.memory_space<vmem>>, vector<1x16x16xf32>
    %58 = vector.shape_cast %57 : vector<1x16x16xf32> to vector<16x16xf32>
    %cst_35 = arith.constant dense<0.000000e+00> : vector<16x128xf32>
    %59 = tpu.matmul %58, %56, %cst_35 {dimension_numbers = #tpu.dot_dimension_numbers<[1], [0], [0], [1], [0, 0, 1, 1], [], []>} : vector<16x16xf32>, vector<16x128xf32>, vector<16x128xf32> -> vector<16x128xf32>
    %60 = arith.addf %55, %59 : vector<16x128xf32>
    %c3_i32 = arith.constant 3 : i32
    %61 = tpu.dynamic_rotate %19 by %c3_i32 dim 1 : vector<16x128xf32>, i32 -> vector<16x128xf32>
    %c8 = arith.constant 8 : index
    %c0_36 = arith.constant 0 : index
    %c0_37 = arith.constant 0 : index
    %62 = vector.load %arg3[%c8, %c0_36, %c0_37] : memref<23x16x16xf32, #tpu.memory_space<vmem>>, vector<1x16x16xf32>
    %63 = vector.shape_cast %62 : vector<1x16x16xf32> to vector<16x16xf32>
    %cst_38 = arith.constant dense<0.000000e+00> : vector<16x128xf32>
    %64 = tpu.matmul %63, %61, %cst_38 {dimension_numbers = #tpu.dot_dimension_numbers<[1], [0], [0], [1], [0, 0, 1, 1], [], []>} : vector<16x16xf32>, vector<16x128xf32>, vector<16x128xf32> -> vector<16x128xf32>
    %65 = arith.addf %60, %64 : vector<16x128xf32>
    %c2_i32 = arith.constant 2 : i32
    %66 = tpu.dynamic_rotate %19 by %c2_i32 dim 1 : vector<16x128xf32>, i32 -> vector<16x128xf32>
    %c9 = arith.constant 9 : index
    %c0_39 = arith.constant 0 : index
    %c0_40 = arith.constant 0 : index
    %67 = vector.load %arg3[%c9, %c0_39, %c0_40] : memref<23x16x16xf32, #tpu.memory_space<vmem>>, vector<1x16x16xf32>
    %68 = vector.shape_cast %67 : vector<1x16x16xf32> to vector<16x16xf32>
    %cst_41 = arith.constant dense<0.000000e+00> : vector<16x128xf32>
    %69 = tpu.matmul %68, %66, %cst_41 {dimension_numbers = #tpu.dot_dimension_numbers<[1], [0], [0], [1], [0, 0, 1, 1], [], []>} : vector<16x16xf32>, vector<16x128xf32>, vector<16x128xf32> -> vector<16x128xf32>
    %70 = arith.addf %65, %69 : vector<16x128xf32>
    %c1_i32_42 = arith.constant 1 : i32
    %71 = tpu.dynamic_rotate %19 by %c1_i32_42 dim 1 : vector<16x128xf32>, i32 -> vector<16x128xf32>
    %c10 = arith.constant 10 : index
    %c0_43 = arith.constant 0 : index
    %c0_44 = arith.constant 0 : index
    %72 = vector.load %arg3[%c10, %c0_43, %c0_44] : memref<23x16x16xf32, #tpu.memory_space<vmem>>, vector<1x16x16xf32>
    %73 = vector.shape_cast %72 : vector<1x16x16xf32> to vector<16x16xf32>
    %cst_45 = arith.constant dense<0.000000e+00> : vector<16x128xf32>
    %74 = tpu.matmul %73, %71, %cst_45 {dimension_numbers = #tpu.dot_dimension_numbers<[1], [0], [0], [1], [0, 0, 1, 1], [], []>} : vector<16x16xf32>, vector<16x128xf32>, vector<16x128xf32> -> vector<16x128xf32>
    %75 = arith.addf %70, %74 : vector<16x128xf32>
    %c11 = arith.constant 11 : index
    %c0_46 = arith.constant 0 : index
    %c0_47 = arith.constant 0 : index
    %76 = vector.load %arg3[%c11, %c0_46, %c0_47] : memref<23x16x16xf32, #tpu.memory_space<vmem>>, vector<1x16x16xf32>
    %77 = vector.shape_cast %76 : vector<1x16x16xf32> to vector<16x16xf32>
    %cst_48 = arith.constant dense<0.000000e+00> : vector<16x128xf32>
    %78 = tpu.matmul %77, %19, %cst_48 {dimension_numbers = #tpu.dot_dimension_numbers<[1], [0], [0], [1], [0, 0, 1, 1], [], []>} : vector<16x16xf32>, vector<16x128xf32>, vector<16x128xf32> -> vector<16x128xf32>
    %79 = arith.addf %75, %78 : vector<16x128xf32>
    %c127_i32_49 = arith.constant 127 : i32
    %80 = tpu.dynamic_rotate %19 by %c127_i32_49 dim 1 : vector<16x128xf32>, i32 -> vector<16x128xf32>
    %c12 = arith.constant 12 : index
    %c0_50 = arith.constant 0 : index
    %c0_51 = arith.constant 0 : index
    %81 = vector.load %arg3[%c12, %c0_50, %c0_51] : memref<23x16x16xf32, #tpu.memory_space<vmem>>, vector<1x16x16xf32>
    %82 = vector.shape_cast %81 : vector<1x16x16xf32> to vector<16x16xf32>
    %cst_52 = arith.constant dense<0.000000e+00> : vector<16x128xf32>
    %83 = tpu.matmul %82, %80, %cst_52 {dimension_numbers = #tpu.dot_dimension_numbers<[1], [0], [0], [1], [0, 0, 1, 1], [], []>} : vector<16x16xf32>, vector<16x128xf32>, vector<16x128xf32> -> vector<16x128xf32>
    %84 = arith.addf %79, %83 : vector<16x128xf32>
    %c126_i32 = arith.constant 126 : i32
    %85 = tpu.dynamic_rotate %19 by %c126_i32 dim 1 : vector<16x128xf32>, i32 -> vector<16x128xf32>
    %c13 = arith.constant 13 : index
    %c0_53 = arith.constant 0 : index
    %c0_54 = arith.constant 0 : index
    %86 = vector.load %arg3[%c13, %c0_53, %c0_54] : memref<23x16x16xf32, #tpu.memory_space<vmem>>, vector<1x16x16xf32>
    %87 = vector.shape_cast %86 : vector<1x16x16xf32> to vector<16x16xf32>
    %cst_55 = arith.constant dense<0.000000e+00> : vector<16x128xf32>
    %88 = tpu.matmul %87, %85, %cst_55 {dimension_numbers = #tpu.dot_dimension_numbers<[1], [0], [0], [1], [0, 0, 1, 1], [], []>} : vector<16x16xf32>, vector<16x128xf32>, vector<16x128xf32> -> vector<16x128xf32>
    %89 = arith.addf %84, %88 : vector<16x128xf32>
    %c125_i32 = arith.constant 125 : i32
    %90 = tpu.dynamic_rotate %19 by %c125_i32 dim 1 : vector<16x128xf32>, i32 -> vector<16x128xf32>
    %c14 = arith.constant 14 : index
    %c0_56 = arith.constant 0 : index
    %c0_57 = arith.constant 0 : index
    %91 = vector.load %arg3[%c14, %c0_56, %c0_57] : memref<23x16x16xf32, #tpu.memory_space<vmem>>, vector<1x16x16xf32>
    %92 = vector.shape_cast %91 : vector<1x16x16xf32> to vector<16x16xf32>
    %cst_58 = arith.constant dense<0.000000e+00> : vector<16x128xf32>
    %93 = tpu.matmul %92, %90, %cst_58 {dimension_numbers = #tpu.dot_dimension_numbers<[1], [0], [0], [1], [0, 0, 1, 1], [], []>} : vector<16x16xf32>, vector<16x128xf32>, vector<16x128xf32> -> vector<16x128xf32>
    %94 = arith.addf %89, %93 : vector<16x128xf32>
    %c124_i32 = arith.constant 124 : i32
    %95 = tpu.dynamic_rotate %19 by %c124_i32 dim 1 : vector<16x128xf32>, i32 -> vector<16x128xf32>
    %c15 = arith.constant 15 : index
    %c0_59 = arith.constant 0 : index
    %c0_60 = arith.constant 0 : index
    %96 = vector.load %arg3[%c15, %c0_59, %c0_60] : memref<23x16x16xf32, #tpu.memory_space<vmem>>, vector<1x16x16xf32>
    %97 = vector.shape_cast %96 : vector<1x16x16xf32> to vector<16x16xf32>
    %cst_61 = arith.constant dense<0.000000e+00> : vector<16x128xf32>
    %98 = tpu.matmul %97, %95, %cst_61 {dimension_numbers = #tpu.dot_dimension_numbers<[1], [0], [0], [1], [0, 0, 1, 1], [], []>} : vector<16x16xf32>, vector<16x128xf32>, vector<16x128xf32> -> vector<16x128xf32>
    %99 = arith.addf %94, %98 : vector<16x128xf32>
    %c123_i32 = arith.constant 123 : i32
    %100 = tpu.dynamic_rotate %19 by %c123_i32 dim 1 : vector<16x128xf32>, i32 -> vector<16x128xf32>
    %c16 = arith.constant 16 : index
    %c0_62 = arith.constant 0 : index
    %c0_63 = arith.constant 0 : index
    %101 = vector.load %arg3[%c16, %c0_62, %c0_63] : memref<23x16x16xf32, #tpu.memory_space<vmem>>, vector<1x16x16xf32>
    %102 = vector.shape_cast %101 : vector<1x16x16xf32> to vector<16x16xf32>
    %cst_64 = arith.constant dense<0.000000e+00> : vector<16x128xf32>
    %103 = tpu.matmul %102, %100, %cst_64 {dimension_numbers = #tpu.dot_dimension_numbers<[1], [0], [0], [1], [0, 0, 1, 1], [], []>} : vector<16x16xf32>, vector<16x128xf32>, vector<16x128xf32> -> vector<16x128xf32>
    %104 = arith.addf %99, %103 : vector<16x128xf32>
    %c122_i32 = arith.constant 122 : i32
    %105 = tpu.dynamic_rotate %19 by %c122_i32 dim 1 : vector<16x128xf32>, i32 -> vector<16x128xf32>
    %c17 = arith.constant 17 : index
    %c0_65 = arith.constant 0 : index
    %c0_66 = arith.constant 0 : index
    %106 = vector.load %arg3[%c17, %c0_65, %c0_66] : memref<23x16x16xf32, #tpu.memory_space<vmem>>, vector<1x16x16xf32>
    %107 = vector.shape_cast %106 : vector<1x16x16xf32> to vector<16x16xf32>
    %cst_67 = arith.constant dense<0.000000e+00> : vector<16x128xf32>
    %108 = tpu.matmul %107, %105, %cst_67 {dimension_numbers = #tpu.dot_dimension_numbers<[1], [0], [0], [1], [0, 0, 1, 1], [], []>} : vector<16x16xf32>, vector<16x128xf32>, vector<16x128xf32> -> vector<16x128xf32>
    %109 = arith.addf %104, %108 : vector<16x128xf32>
    %c121_i32 = arith.constant 121 : i32
    %110 = tpu.dynamic_rotate %19 by %c121_i32 dim 1 : vector<16x128xf32>, i32 -> vector<16x128xf32>
    %c18 = arith.constant 18 : index
    %c0_68 = arith.constant 0 : index
    %c0_69 = arith.constant 0 : index
    %111 = vector.load %arg3[%c18, %c0_68, %c0_69] : memref<23x16x16xf32, #tpu.memory_space<vmem>>, vector<1x16x16xf32>
    %112 = vector.shape_cast %111 : vector<1x16x16xf32> to vector<16x16xf32>
    %cst_70 = arith.constant dense<0.000000e+00> : vector<16x128xf32>
    %113 = tpu.matmul %112, %110, %cst_70 {dimension_numbers = #tpu.dot_dimension_numbers<[1], [0], [0], [1], [0, 0, 1, 1], [], []>} : vector<16x16xf32>, vector<16x128xf32>, vector<16x128xf32> -> vector<16x128xf32>
    %114 = arith.addf %109, %113 : vector<16x128xf32>
    %c120_i32 = arith.constant 120 : i32
    %115 = tpu.dynamic_rotate %19 by %c120_i32 dim 1 : vector<16x128xf32>, i32 -> vector<16x128xf32>
    %c19 = arith.constant 19 : index
    %c0_71 = arith.constant 0 : index
    %c0_72 = arith.constant 0 : index
    %116 = vector.load %arg3[%c19, %c0_71, %c0_72] : memref<23x16x16xf32, #tpu.memory_space<vmem>>, vector<1x16x16xf32>
    %117 = vector.shape_cast %116 : vector<1x16x16xf32> to vector<16x16xf32>
    %cst_73 = arith.constant dense<0.000000e+00> : vector<16x128xf32>
    %118 = tpu.matmul %117, %115, %cst_73 {dimension_numbers = #tpu.dot_dimension_numbers<[1], [0], [0], [1], [0, 0, 1, 1], [], []>} : vector<16x16xf32>, vector<16x128xf32>, vector<16x128xf32> -> vector<16x128xf32>
    %119 = arith.addf %114, %118 : vector<16x128xf32>
    %c119_i32 = arith.constant 119 : i32
    %120 = tpu.dynamic_rotate %19 by %c119_i32 dim 1 : vector<16x128xf32>, i32 -> vector<16x128xf32>
    %c20 = arith.constant 20 : index
    %c0_74 = arith.constant 0 : index
    %c0_75 = arith.constant 0 : index
    %121 = vector.load %arg3[%c20, %c0_74, %c0_75] : memref<23x16x16xf32, #tpu.memory_space<vmem>>, vector<1x16x16xf32>
    %122 = vector.shape_cast %121 : vector<1x16x16xf32> to vector<16x16xf32>
    %cst_76 = arith.constant dense<0.000000e+00> : vector<16x128xf32>
    %123 = tpu.matmul %122, %120, %cst_76 {dimension_numbers = #tpu.dot_dimension_numbers<[1], [0], [0], [1], [0, 0, 1, 1], [], []>} : vector<16x16xf32>, vector<16x128xf32>, vector<16x128xf32> -> vector<16x128xf32>
    %124 = arith.addf %119, %123 : vector<16x128xf32>
    %c118_i32 = arith.constant 118 : i32
    %125 = tpu.dynamic_rotate %19 by %c118_i32 dim 1 : vector<16x128xf32>, i32 -> vector<16x128xf32>
    %c21 = arith.constant 21 : index
    %c0_77 = arith.constant 0 : index
    %c0_78 = arith.constant 0 : index
    %126 = vector.load %arg3[%c21, %c0_77, %c0_78] : memref<23x16x16xf32, #tpu.memory_space<vmem>>, vector<1x16x16xf32>
    %127 = vector.shape_cast %126 : vector<1x16x16xf32> to vector<16x16xf32>
    %cst_79 = arith.constant dense<0.000000e+00> : vector<16x128xf32>
    %128 = tpu.matmul %127, %125, %cst_79 {dimension_numbers = #tpu.dot_dimension_numbers<[1], [0], [0], [1], [0, 0, 1, 1], [], []>} : vector<16x16xf32>, vector<16x128xf32>, vector<16x128xf32> -> vector<16x128xf32>
    %129 = arith.addf %124, %128 : vector<16x128xf32>
    %c117_i32 = arith.constant 117 : i32
    %130 = tpu.dynamic_rotate %19 by %c117_i32 dim 1 : vector<16x128xf32>, i32 -> vector<16x128xf32>
    %c22 = arith.constant 22 : index
    %c0_80 = arith.constant 0 : index
    %c0_81 = arith.constant 0 : index
    %131 = vector.load %arg3[%c22, %c0_80, %c0_81] : memref<23x16x16xf32, #tpu.memory_space<vmem>>, vector<1x16x16xf32>
    %132 = vector.shape_cast %131 : vector<1x16x16xf32> to vector<16x16xf32>
    %cst_82 = arith.constant dense<0.000000e+00> : vector<16x128xf32>
    %133 = tpu.matmul %132, %130, %cst_82 {dimension_numbers = #tpu.dot_dimension_numbers<[1], [0], [0], [1], [0, 0, 1, 1], [], []>} : vector<16x16xf32>, vector<16x128xf32>, vector<16x128xf32> -> vector<16x128xf32>
    %134 = arith.addf %129, %133 : vector<16x128xf32>
    %cst_83 = arith.constant 0.000000e+00 : f32
    %135 = vector.broadcast %cst_83 : f32 to vector<16x128xf32>
    %136 = arith.maximumf %134, %135 : vector<16x128xf32>
    %137 = vector.extract_strided_slice %4 {offsets = [0, 0], sizes = [8, 128], strides = [1, 1]} : vector<24x128xf32> to vector<8x128xf32>
    %c0_84 = arith.constant 0 : index
    %c0_85 = arith.constant 0 : index
    %138 = vector.load %arg4[%c0_84, %c0_85] : memref<32x128xf32, #tpu.memory_space<vmem>>, vector<8x128xf32>
    tpu.vector_store %arg4[%c0_84, %c0_85], %137 {strides = array<i32>} : memref<32x128xf32, #tpu.memory_space<vmem>>, vector<8x128xf32>,
    %c8_86 = arith.constant 8 : index
    %c0_87 = arith.constant 0 : index
    %139 = vector.load %arg4[%c8_86, %c0_87] : memref<32x128xf32, #tpu.memory_space<vmem>>, vector<16x128xf32>
    tpu.vector_store %arg4[%c8_86, %c0_87], %136 {strides = array<i32>} : memref<32x128xf32, #tpu.memory_space<vmem>>, vector<16x128xf32>,
    %c24 = arith.constant 24 : index
    %c0_88 = arith.constant 0 : index
    %140 = vector.load %arg4[%c24, %c0_88] : memref<32x128xf32, #tpu.memory_space<vmem>>, vector<8x128xf32>
    tpu.vector_store %arg4[%c24, %c0_88], %18 {strides = array<i32>} : memref<32x128xf32, #tpu.memory_space<vmem>>, vector<8x128xf32>,
    return
  }
}

</mosaic_0001>

<bundles_post_ra>
// kernel: inception_forward.1
= control target key start
LH: loop header
LB: loop body
LE: loop exit
PB: predicated region body
PF: predicated region fallthrough
CT: control target
= control target key end

     0   :  { %vm21_vm0 = vcmask 64512   ;;  %v2665_v0 = vmov 0.0   ;;  %vm2666_vm1 = vmmov 0   ;;  %s2667_s22 = smov 1   ;;  %s2668_s23 = smov 127   ;;  %v121_v8 = vlaneseq  ;;  %s3041_s0 = inlined_call_operand.vmem [shape: f32[8,128], index: 0, kind: input, shape index: {}]   ;;  %s3042_s1 = inlined_call_operand.vmem [shape: f32[24,8], index: 1, kind: input, shape index: {}]   ;;  %s3043_s4 = inlined_call_operand.vmem [shape: f32[32,128], index: 4, kind: output, shape index: {}]   ;;  %s3044_s3 = inlined_call_operand.vmem [shape: f32[23,16,16], index: 3, kind: input, shape index: {}]   ;;  %s3045_s2 = inlined_call_operand.vmem [shape: f32[8,8], index: 2, kind: input, shape index: {}]  }
   0x1   :  { %2464 = vmatprep.subr.mxu0 %v2665_v0  ;;  %v17_v1 = vld [vmem:[%s3041_s0] sm:$0xff]  ;;  %2466 = vmatprep.mubr.msk.f32.mxu0 %vm2666_vm1, %v2665_v0  ;;  %v19_v3 = vld [vmem:[%s3042_s1 + $0x8] sm:$0xff]  ;;  %v20_v4 = vld [vmem:[%s3042_s1 + $0x10] sm:$0xff]  ;;  %s2669_s25 = smov 10   ;;  %vm213_vm3 = vcmask 130048   ;;  %s2670_s28 = smov 11  }
   0x2   :  { %v18_v2 = vld [vmem:[%s3042_s1] sm:$0xff]  ;;  %2465 = vmatpush3.msra.mxu0 %v17_v1  ;;  %2475 = vmatprep.subr.mxu1 %v2665_v0  ;;  %v122_v10 = vshrl.u32 %v121_v8, 7  ;;  %s2671_s29 = smov 9   ;;  %s2672_s30 = smov 8   ;;  %v2276_v24 = vld [vmem:[%s3044_s3 + $0x10] sm:$0xff]  ;;  %v2283_v30 = vld [vmem:[%s3044_s3 + $0x28] sm:$0xff] }
   0x3   :  { %2467 = vmatmul.mubr.msk.f32.vlgmr.msra.gmra.mxu0 %vm21_vm0, %v18_v2  ;;  %2477 = vmatprep.mubr.msk.f32.mxu1 %vm2666_vm1, %v2665_v0  ;;  %v2282_v21 = vld [vmem:[%s3044_s3 + $0x20] sm:$0xff]  ;;  %s2673_s5 = smov 7   ;;  %s2674_s6 = smov 6   ;;  %v2291_v36 = vld [vmem:[%s3044_s3 + $0x48] sm:$0xff]  ;;  %v2277_v54 = vld [vmem:[%s3044_s3 + $0x18] sm:$0xff] }
   0x4   :  { %2469 = vmatprep.mubr.msk.f32.mxu0 %vm2666_vm1, %v2665_v0  ;;  %114 = vrot.lane.b32.xlu0 %v17_v1, %s2667_s22  ;;  %vm123_vm2 = vcmp.lt.s32.totalorder %v122_v10, 4  ;;  %v125_v23 = vld [vmem:[%s3045_s2] sm:$0xff]  ;;  %s2675_s9 = smov 5   ;;  %s2676_s10 = smov 4   ;;  %v2299_v42 = vld [vmem:[%s3044_s3 + $0x68] sm:$0xff]  ;;  %v2286_v62 = vld [vmem:[%s3044_s3 + $0x30] sm:$0xff] }
   0x5   :  { %s2677_s13 = smov 3   ;;  %s2678_s2 = smov 2   ;;  %v2290_v31 = vld [vmem:[%s3044_s3 + $0x40] sm:$0xff]  ;;  %v2307_v48 = vld [vmem:[%s3044_s3 + $0x88] sm:$0xff]  ;;  %v2287_v2 = vld [vmem:[%s3044_s3 + $0x38] sm:$0xff] }
   0x6   :  { %s2679_s14 = smov 126   ;;  %s2680_s15 = smov 125   ;;  %v2298_v37 = vld [vmem:[%s3044_s3 + $0x60] sm:$0xff]  ;;  %v2315_v58 = vld [vmem:[%s3044_s3 + $0xa8] sm:$0xff]  ;;  %v2302_v8 = vld [vmem:[%s3044_s3 + $0x70] sm:$0xff] }
   0x7   :  { %2470 = vmatmul.mubr.msk.f32.gmra.mxu0 %vm21_vm0, %v19_v3  ;;  %s2681_s16 = smov 124   ;;  %s2682_s17 = smov 123   ;;  %v2306_v43 = vld [vmem:[%s3044_s3 + $0x80] sm:$0xff]  ;;  %v205_v59 = vld [vmem:[%s3044_s3 + $0x8] sm:$0xff] }
   0x8   :  { %2472 = vmatprep.mubr.msk.f32.mxu0 %vm2666_vm1, %v2665_v0  ;;  %117 = vrot.lane.b32.xlu0 %v17_v1, %s2668_s23  ;;  %s2683_s18 = smov 122   ;;  %s2684_s19 = smov 121   ;;  %v2314_v49 = vld [vmem:[%s3044_s3 + $0xa0] sm:$0xff]  ;;  %v2323_v3 = vld [vmem:[%s3044_s3 + $0xc8] sm:$0xff] }
   0x9   :  { %s2685_s20 = smov 120   ;;  %s2686_s0 = smov 119   ;;  %v204_v57 = vld [vmem:[%s3044_s3] sm:$0xff] }
   0xa   :  { %s2687_s21 = smov 118   ;;  %v2322_v63 = vld [vmem:[%s3044_s3 + $0xc0] sm:$0xff] }
   0xb   :  { %2473 = vmatmul.mubr.msk.f32.gmra.mxu0 %vm21_vm0, %v20_v4 }
   0xc   :  { %2498 = vmatprep.mubr.msk.f32.mxu0 %vm213_vm3, %v2282_v21  ;;  %v2318_v21 = vld [vmem:[%s3044_s3 + $0xb0] sm:$0xff] }
  0x76   :  { %v115_v5 = vpop.permute.xlu0 %114 }
  0x77   :  { %v116_v6 = vadd.f32 %v115_v5, %v17_v1  ;;  %v2294_v5 = vld [vmem:[%s3044_s3 + $0x50] sm:$0xff] }
  0x7a   :  { %v118_v7 = vpop.permute.xlu0 %117 }
  0x7b   :  { %v119_v9 = vadd.f32 %v118_v7, %v116_v6  ;;  %v2295_v7 = vld [vmem:[%s3044_s3 + $0x58] sm:$0xff] }
  0x7d   :  { %v120_v11 = vmul.f32 0.33333334, %v119_v9 }
  0x7f   :  { %v124_v12 = vsel %vm123_vm2, %v120_v11, %v17_v1  ;;  %v2330_v11 = vld [vmem:[%s3044_s3 + $0xe0] sm:$0xff] }
  0x80   :  { %2476 = vmatpush3.msra.mxu1 %v124_v12  ;;  %v2303_v12 = vld [vmem:[%s3044_s3 + $0x78] sm:$0xff] }
  0x81   :  { %2478 = vmatmul.mubr.msk.f32.vlgmr.msra.gmra.mxu1 %vm21_vm0, %v125_v23  ;;  %v2338_v23 = vld [vmem:[%s3044_s3 + $0x100] sm:$0xff] }
  0x82   :  { %2484 = vmatprep.mubr.msk.f32.mxu1 %vm213_vm3, %v2276_v24  ;;  %v2319_v24 = vld [vmem:[%s3044_s3 + $0xb8] sm:$0xff] }
  0xc3   :  { %v97_v13 = vpop.f32.mrf.mxu0 }
  0xc4   :  { %v111_v14 = vmax.f32 %v97_v13, 0.0  ;;  %v2331_v13 = vld [vmem:[%s3044_s3 + $0xe8] sm:$0xff] }
  0xc5   :  { %v2468_v15 = vpop.f32.mrf.mxu0 }
  0xc6   :  { %2264 = vst [vmem:[%s3043_s4] sm:$0xff] %v111_v14 }
  0xc7   :  { %v102_v16 = vpop.f32.mrf.mxu0 }
  0xc8   :  { %v2734_v17 = vmax.f32 %v102_v16, 0.0  ;;  %v2310_v16 = vld [vmem:[%s3044_s3 + $0x90] sm:$0xff] }
  0xc9   :  { %v2471_v18 = vpop.f32.mrf.mxu0 }
  0xca   :  { %206 = vrot.lane.b32.xlu1 %v2734_v17, %s2669_s25  ;;  %v2311_v18 = vld [vmem:[%s3044_s3 + $0x98] sm:$0xff] }
  0xcb   :  { %v107_v19 = vpop.f32.mrf.mxu0 }
  0xcc   :  { %v2738_v20 = vmax.f32 %v107_v19, 0.0 }
  0xcd   :  { %v2474_v22 = vpop.f32.mrf.mxu0 }
  0xce   :  { %200 = vrot.lane.b32.xlu1 %v2734_v17, %s2670_s28  ;;  %202 = vrot.lane.b32.xlu0 %v2738_v20, %s2670_s28 }
  0xd2   :  { %376 = vrot.lane.b32.xlu1 %v2734_v17, %s2671_s29  ;;  %378 = vrot.lane.b32.xlu0 %v2738_v20, %s2671_s29 }
  0xd6   :  { %466 = vrot.lane.b32.xlu1 %v2734_v17, %s2672_s30  ;;  %468 = vrot.lane.b32.xlu0 %v2738_v20, %s2672_s30 }
  0xda   :  { %556 = vrot.lane.b32.xlu1 %v2734_v17, %s2673_s5  ;;  %558 = vrot.lane.b32.xlu0 %v2738_v20, %s2673_s5 }
  0xde   :  { %646 = vrot.lane.b32.xlu1 %v2734_v17, %s2674_s6  ;;  %648 = vrot.lane.b32.xlu0 %v2738_v20, %s2674_s6 }
  0xe2   :  { %736 = vrot.lane.b32.xlu1 %v2734_v17, %s2675_s9  ;;  %738 = vrot.lane.b32.xlu0 %v2738_v20, %s2675_s9 }
  0xe6   :  { %826 = vrot.lane.b32.xlu1 %v2734_v17, %s2676_s10  ;;  %828 = vrot.lane.b32.xlu0 %v2738_v20, %s2676_s10 }
  0xea   :  { %916 = vrot.lane.b32.xlu1 %v2734_v17, %s2677_s13  ;;  %918 = vrot.lane.b32.xlu0 %v2738_v20, %s2677_s13 }
  0xee   :  { %1006 = vrot.lane.b32.xlu1 %v2734_v17, %s2678_s2  ;;  %1008 = vrot.lane.b32.xlu0 %v2738_v20, %s2678_s2 }
  0xf2   :  { %1098 = vrot.lane.b32.xlu0 %v2738_v20, %s2667_s22  ;;  %208 = vrot.lane.b32.xlu1 %v2738_v20, %s2669_s25 }
  0xf6   :  { %1274 = vrot.lane.b32.xlu0 %v2738_v20, %s2668_s23  ;;  %1096 = vrot.lane.b32.xlu1 %v2734_v17, %s2667_s22  ;;  %s2688_s22 = smov 117  }
  0xfa   :  { %1364 = vrot.lane.b32.xlu0 %v2738_v20, %s2679_s14  ;;  %1272 = vrot.lane.b32.xlu1 %v2734_v17, %s2668_s23 }
  0xfe   :  { %1454 = vrot.lane.b32.xlu0 %v2738_v20, %s2680_s15  ;;  %1362 = vrot.lane.b32.xlu1 %v2734_v17, %s2679_s14 }
 0x102   :  { %1544 = vrot.lane.b32.xlu0 %v2738_v20, %s2681_s16  ;;  %1452 = vrot.lane.b32.xlu1 %v2734_v17, %s2680_s15 }
 0x106   :  { %1634 = vrot.lane.b32.xlu0 %v2738_v20, %s2682_s17  ;;  %1542 = vrot.lane.b32.xlu1 %v2734_v17, %s2681_s16 }
 0x10a   :  { %1724 = vrot.lane.b32.xlu0 %v2738_v20, %s2683_s18  ;;  %1632 = vrot.lane.b32.xlu1 %v2734_v17, %s2682_s17 }
 0x10e   :  { %1814 = vrot.lane.b32.xlu0 %v2738_v20, %s2684_s19  ;;  %1722 = vrot.lane.b32.xlu1 %v2734_v17, %s2683_s18 }
 0x112   :  { %1904 = vrot.lane.b32.xlu0 %v2738_v20, %s2685_s20  ;;  %1812 = vrot.lane.b32.xlu1 %v2734_v17, %s2684_s19 }
 0x116   :  { %1994 = vrot.lane.b32.xlu0 %v2738_v20, %s2686_s0  ;;  %1902 = vrot.lane.b32.xlu1 %v2734_v17, %s2685_s20 }
 0x11a   :  { %2084 = vrot.lane.b32.xlu0 %v2738_v20, %s2687_s21  ;;  %1992 = vrot.lane.b32.xlu1 %v2734_v17, %s2686_s0 }
 0x11e   :  { %2174 = vrot.lane.b32.xlu0 %v2738_v20, %s2688_s22  ;;  %2082 = vrot.lane.b32.xlu1 %v2734_v17, %s2687_s21 }
 0x122   :  { %2172 = vrot.lane.b32.xlu1 %v2734_v17, %s2688_s22 }
 0x13c   :  { %v207_v25 = vpop.permute.xlu1 %206 }
 0x140   :  { %v2800_v26 = vpop.permute.xlu1 %200  ;;  %v203_v27 = vpop.permute.xlu0 %202 }
 0x144   :  { %v377_v28 = vpop.permute.xlu1 %376  ;;  %v379_v29 = vpop.permute.xlu0 %378 }
 0x145   :  { %2494 = vmatprep.subr.mxu0 %v379_v29 }
 0x146   :  { %2495 = vmatpush3.msra.mxu0 %v379_v29 }
 0x147   :  { %2496 = vmatprep.subr.mxu0 %v377_v28 }
 0x148   :  { %v2808_v32 = vpop.permute.xlu1 %466  ;;  %2497 = vmatpush3.msra.mxu0 %v377_v28  ;;  %v2810_v33 = vpop.permute.xlu0 %468 }
 0x149   :  { %2499 = vmatmul.mubr.msk.f32.vlgmr.msra.gmra.mxu0 %vm213_vm3, %v2283_v30  ;;  %v2334_v30 = vld [vmem:[%s3044_s3 + $0xf0] sm:$0xff] }
 0x14a   :  { %2512 = vmatprep.mubr.msk.f32.mxu0 %vm213_vm3, %v2290_v31  ;;  %v2346_v31 = vld [vmem:[%s3044_s3 + $0x120] sm:$0xff] }
 0x14c   :  { %v557_v34 = vpop.permute.xlu1 %556  ;;  %v559_v35 = vpop.permute.xlu0 %558 }
 0x14d   :  { %2508 = vmatprep.subr.mxu0 %v559_v35 }
 0x14e   :  { %2509 = vmatpush3.msra.mxu0 %v559_v35 }
 0x14f   :  { %2510 = vmatprep.subr.mxu0 %v557_v34 }
 0x150   :  { %v2820_v38 = vpop.permute.xlu1 %646  ;;  %2511 = vmatpush3.msra.mxu0 %v557_v34  ;;  %v2822_v39 = vpop.permute.xlu0 %648  ;;  %v2347_v34 = vld [vmem:[%s3044_s3 + $0x128] sm:$0xff] }
 0x151   :  { %2513 = vmatmul.mubr.msk.f32.vlgmr.msra.gmra.mxu0 %vm213_vm3, %v2291_v36  ;;  %v2342_v36 = vld [vmem:[%s3044_s3 + $0x110] sm:$0xff] }
 0x152   :  { %2526 = vmatprep.mubr.msk.f32.mxu0 %vm213_vm3, %v2298_v37  ;;  %v2343_v37 = vld [vmem:[%s3044_s3 + $0x118] sm:$0xff] }
 0x154   :  { %v737_v40 = vpop.permute.xlu1 %736  ;;  %v739_v41 = vpop.permute.xlu0 %738 }
 0x155   :  { %2522 = vmatprep.subr.mxu0 %v739_v41 }
 0x156   :  { %2523 = vmatpush3.msra.mxu0 %v739_v41  ;;  %v2351_v41 = vld [vmem:[%s3044_s3 + $0x138] sm:$0xff] }
 0x157   :  { %2524 = vmatprep.subr.mxu0 %v737_v40 }
 0x158   :  { %v2832_v44 = vpop.permute.xlu1 %826  ;;  %2525 = vmatpush3.msra.mxu0 %v737_v40  ;;  %v2834_v45 = vpop.permute.xlu0 %828  ;;  %v2354_v40 = vld [vmem:[%s3044_s3 + $0x140] sm:$0xff] }
 0x159   :  { %2527 = vmatmul.mubr.msk.f32.vlgmr.msra.gmra.mxu0 %vm213_vm3, %v2299_v42 }
 0x15a   :  { %2540 = vmatprep.mubr.msk.f32.mxu0 %vm213_vm3, %v2306_v43  ;;  %v2355_v43 = vld [vmem:[%s3044_s3 + $0x148] sm:$0xff] }
 0x15c   :  { %v917_v46 = vpop.permute.xlu1 %916  ;;  %v919_v47 = vpop.permute.xlu0 %918 }
 0x15d   :  { %2536 = vmatprep.subr.mxu0 %v919_v47 }
 0x15e   :  { %2537 = vmatpush3.msra.mxu0 %v919_v47  ;;  %v2362_v47 = vld [vmem:[%s3044_s3 + $0x160] sm:$0xff] }
 0x15f   :  { %2538 = vmatprep.subr.mxu0 %v917_v46 }
 0x160   :  { %v2844_v50 = vpop.permute.xlu1 %1006  ;;  %2539 = vmatpush3.msra.mxu0 %v917_v46  ;;  %v2846_v51 = vpop.permute.xlu0 %1008  ;;  %v2359_v46 = vld [vmem:[%s3044_s3 + $0x158] sm:$0xff] }
 0x161   :  { %2541 = vmatmul.mubr.msk.f32.vlgmr.msra.gmra.mxu0 %vm213_vm3, %v2307_v48  ;;  %v2363_v48 = vld [vmem:[%s3044_s3 + $0x168] sm:$0xff] }
 0x162   :  { %2554 = vmatprep.mubr.msk.f32.mxu0 %vm213_vm3, %v2314_v49  ;;  %v195_v49 = vpop.f32.mrf.mxu1 }
 0x164   :  { %v1099_v52 = vpop.permute.xlu0 %1098  ;;  %v209_v53 = vpop.permute.xlu1 %208 }
 0x165   :  { %2480 = vmatprep.subr.mxu1 %v209_v53  ;;  %2550 = vmatprep.subr.mxu0 %v1099_v52 }
 0x166   :  { %2481 = vmatpush3.msra.mxu1 %v209_v53  ;;  %2551 = vmatpush3.msra.mxu0 %v1099_v52 }
 0x167   :  { %2482 = vmatprep.subr.mxu1 %v207_v25 }
 0x168   :  { %v1275_v55 = vpop.permute.xlu0 %1274  ;;  %2483 = vmatpush3.msra.mxu1 %v207_v25  ;;  %v1097_v56 = vpop.permute.xlu1 %1096  ;;  %v2339_v25 = vld [vmem:[%s3044_s3 + $0x108] sm:$0xff] }
 0x169   :  { %2485 = vmatmul.mubr.msk.f32.vlgmr.msra.gmra.mxu1 %vm213_vm3, %v2277_v54  ;;  %2487 = vmatprep.subr.mxu1 %v203_v27 }
 0x16a   :  { %2552 = vmatprep.subr.mxu0 %v1097_v56  ;;  %2488 = vmatpush3.msra.mxu1 %v203_v27 }
 0x16b   :  { %2553 = vmatpush3.msra.mxu0 %v1097_v56  ;;  %2489 = vmatprep.subr.mxu1 %v2800_v26 }
 0x16c   :  { %2564 = vmatprep.subr.mxu0 %v1275_v55  ;;  %v2864_v60 = vpop.permute.xlu0 %1364  ;;  %2490 = vmatpush3.msra.mxu1 %v2800_v26  ;;  %v1273_v61 = vpop.permute.xlu1 %1272 }
 0x16d   :  { %2491 = vmatprep.mubr.msk.f32.mxu1 %vm213_vm3, %v204_v57  ;;  %2555 = vmatmul.mubr.msk.f32.vlgmr.msra.gmra.mxu0 %vm213_vm3, %v2315_v58 }
 0x16e   :  { %2565 = vmatpush3.msra.mxu0 %v1275_v55  ;;  %2492 = vmatmul.mubr.msk.f32.vlgmr.msra.gmra.mxu1 %vm213_vm3, %v205_v59 }
 0x16f   :  { %2501 = vmatprep.subr.mxu1 %v2810_v33  ;;  %2566 = vmatprep.subr.mxu0 %v1273_v61 }
 0x170   :  { %2502 = vmatpush3.msra.mxu1 %v2810_v33  ;;  %2567 = vmatpush3.msra.mxu0 %v1273_v61  ;;  %v1455_v0 = vpop.permute.xlu0 %1454  ;;  %v2878_v1 = vpop.permute.xlu1 %1362 }
 0x171   :  { %2503 = vmatprep.subr.mxu1 %v2808_v32  ;;  %2505 = vmatprep.mubr.msk.f32.mxu1 %vm213_vm3, %v2286_v62 }
 0x172   :  { %2504 = vmatpush3.msra.mxu1 %v2808_v32  ;;  %2568 = vmatprep.mubr.msk.f32.mxu0 %vm213_vm3, %v2322_v63  ;;  %v2335_v32 = vld [vmem:[%s3044_s3 + $0xf8] sm:$0xff] }
 0x173   :  { %2506 = vmatmul.mubr.msk.f32.vlgmr.msra.gmra.mxu1 %vm213_vm3, %v2287_v2  ;;  %2515 = vmatprep.subr.mxu1 %v2822_v39 }
 0x174   :  { %2578 = vmatprep.subr.mxu0 %v1455_v0  ;;  %2516 = vmatpush3.msra.mxu1 %v2822_v39  ;;  %v2893_v4 = vpop.permute.xlu0 %1544  ;;  %v1453_v6 = vpop.permute.xlu1 %1452 }
 0x175   :  { %2569 = vmatmul.mubr.msk.f32.vlgmr.msra.gmra.mxu0 %vm213_vm3, %v2323_v3  ;;  %2517 = vmatprep.subr.mxu1 %v2820_v38 }
 0x176   :  { %2579 = vmatpush3.msra.mxu0 %v1455_v0  ;;  %2518 = vmatpush3.msra.mxu1 %v2820_v38  ;;  %v2350_v38 = vld [vmem:[%s3044_s3 + $0x130] sm:$0xff] }
 0x177   :  { %2519 = vmatprep.mubr.msk.f32.mxu1 %vm213_vm3, %v2294_v5  ;;  %2529 = vmatprep.subr.mxu1 %v2834_v45 }
 0x178   :  { %2520 = vmatmul.mubr.msk.f32.vlgmr.msra.gmra.mxu1 %vm213_vm3, %v2295_v7  ;;  %2580 = vmatprep.subr.mxu0 %v1453_v6  ;;  %v1635_v9 = vpop.permute.xlu0 %1634  ;;  %v2910_v10 = vpop.permute.xlu1 %1542 }
 0x179   :  { %2530 = vmatpush3.msra.mxu1 %v2834_v45  ;;  %2581 = vmatpush3.msra.mxu0 %v1453_v6 }
 0x17a   :  { %2531 = vmatprep.subr.mxu1 %v2832_v44  ;;  %2533 = vmatprep.mubr.msk.f32.mxu1 %vm213_vm3, %v2302_v8 }
 0x17b   :  { %2532 = vmatpush3.msra.mxu1 %v2832_v44  ;;  %2582 = vmatprep.mubr.msk.f32.mxu0 %vm213_vm3, %v2330_v11  ;;  %v2358_v44 = vld [vmem:[%s3044_s3 + $0x150] sm:$0xff] }
 0x17c   :  { %2534 = vmatmul.mubr.msk.f32.vlgmr.msra.gmra.mxu1 %vm213_vm3, %v2303_v12  ;;  %2543 = vmatprep.subr.mxu1 %v2846_v51  ;;  %v1725_v14 = vpop.permute.xlu0 %1724  ;;  %v1633_v15 = vpop.permute.xlu1 %1632 }
 0x17d   :  { %2592 = vmatprep.subr.mxu0 %v1635_v9  ;;  %2544 = vmatpush3.msra.mxu1 %v2846_v51  ;;  %v2479_v51 = vpop.f32.mrf.mxu1 }
 0x17e   :  { %2583 = vmatmul.mubr.msk.f32.vlgmr.msra.gmra.mxu0 %vm213_vm3, %v2331_v13  ;;  %2545 = vmatprep.subr.mxu1 %v2844_v50 }
 0x17f   :  { %2593 = vmatpush3.msra.mxu0 %v1635_v9  ;;  %2546 = vmatpush3.msra.mxu1 %v2844_v50  ;;  %v199_v50 = vmax.f32 %v195_v49, 0.0 }
 0x180   :  { %2547 = vmatprep.mubr.msk.f32.mxu1 %vm213_vm3, %v2310_v16  ;;  %2557 = vmatprep.subr.mxu1 %v2738_v20  ;;  %v1815_v19 = vpop.permute.xlu0 %1814  ;;  %v1723_v22 = vpop.permute.xlu1 %1722 }
 0x181   :  { %2548 = vmatmul.mubr.msk.f32.vlgmr.msra.gmra.mxu1 %vm213_vm3, %v2311_v18  ;;  %2594 = vmatprep.subr.mxu0 %v1633_v15  ;;  %2267 = vst [vmem:[%s3043_s4 + $0x18] sm:$0xff] %v199_v50 }
 0x182   :  { %2558 = vmatpush3.msra.mxu1 %v2738_v20  ;;  %2595 = vmatpush3.msra.mxu0 %v1633_v15  ;;  %v2326_v20 = vld [vmem:[%s3044_s3 + $0xd0] sm:$0xff] }
 0x183   :  { %2559 = vmatprep.subr.mxu1 %v2734_v17  ;;  %2561 = vmatprep.mubr.msk.f32.mxu1 %vm213_vm3, %v2318_v21 }
 0x184   :  { %2560 = vmatpush3.msra.mxu1 %v2734_v17  ;;  %2596 = vmatprep.mubr.msk.f32.mxu0 %vm213_vm3, %v2338_v23  ;;  %v1905_v26 = vpop.permute.xlu0 %1904  ;;  %v1813_v27 = vpop.permute.xlu1 %1812  ;;  %v2327_v17 = vld [vmem:[%s3044_s3 + $0xd8] sm:$0xff] }
 0x185   :  { %2562 = vmatmul.mubr.msk.f32.vlgmr.msra.gmra.mxu1 %vm213_vm3, %v2319_v24  ;;  %2571 = vmatprep.subr.mxu1 %v2864_v60 }
 0x186   :  { %2606 = vmatprep.subr.mxu0 %v1815_v19  ;;  %2572 = vmatpush3.msra.mxu1 %v2864_v60 }
 0x187   :  { %2597 = vmatmul.mubr.msk.f32.vlgmr.msra.gmra.mxu0 %vm213_vm3, %v2339_v25  ;;  %2573 = vmatprep.subr.mxu1 %v2878_v1 }
 0x188   :  { %2607 = vmatpush3.msra.mxu0 %v1815_v19  ;;  %2574 = vmatpush3.msra.mxu1 %v2878_v1  ;;  %v1903_v28 = vpop.permute.xlu1 %1902  ;;  %v1995_v29 = vpop.permute.xlu0 %1994 }
 0x189   :  { %2575 = vmatprep.mubr.msk.f32.mxu1 %vm213_vm3, %v2326_v20  ;;  %2585 = vmatprep.subr.mxu1 %v2893_v4 }
 0x18a   :  { %2576 = vmatmul.mubr.msk.f32.vlgmr.msra.gmra.mxu1 %vm213_vm3, %v2327_v17  ;;  %2608 = vmatprep.subr.mxu0 %v1813_v27 }
 0x18b   :  { %2586 = vmatpush3.msra.mxu1 %v2893_v4  ;;  %2609 = vmatpush3.msra.mxu0 %v1813_v27 }
 0x18c   :  { %2587 = vmatprep.subr.mxu1 %v2910_v10  ;;  %2589 = vmatprep.mubr.msk.f32.mxu1 %vm213_vm3, %v2334_v30  ;;  %v1993_v33 = vpop.permute.xlu1 %1992  ;;  %v2085_v35 = vpop.permute.xlu0 %2084 }
 0x18d   :  { %2588 = vmatpush3.msra.mxu1 %v2910_v10  ;;  %2610 = vmatprep.mubr.msk.f32.mxu0 %vm213_vm3, %v2346_v31 }
 0x18e   :  { %2590 = vmatmul.mubr.msk.f32.vlgmr.msra.gmra.mxu1 %vm213_vm3, %v2335_v32  ;;  %2599 = vmatprep.subr.mxu1 %v1725_v14 }
 0x18f   :  { %2620 = vmatprep.subr.mxu0 %v1995_v29  ;;  %2600 = vmatpush3.msra.mxu1 %v1725_v14 }
 0x190   :  { %2611 = vmatmul.mubr.msk.f32.vlgmr.msra.gmra.mxu0 %vm213_vm3, %v2347_v34  ;;  %2601 = vmatprep.subr.mxu1 %v1723_v22  ;;  %v2083_v39 = vpop.permute.xlu1 %2082  ;;  %v2175_v42 = vpop.permute.xlu0 %2174 }
 0x191   :  { %2621 = vmatpush3.msra.mxu0 %v1995_v29  ;;  %2602 = vmatpush3.msra.mxu1 %v1723_v22 }
 0x192   :  { %2603 = vmatprep.mubr.msk.f32.mxu1 %vm213_vm3, %v2342_v36  ;;  %2613 = vmatprep.subr.mxu1 %v1905_v26 }
 0x193   :  { %2604 = vmatmul.mubr.msk.f32.vlgmr.msra.gmra.mxu1 %vm213_vm3, %v2343_v37  ;;  %2622 = vmatprep.subr.mxu0 %v1993_v33 }
 0x194   :  { %2614 = vmatpush3.msra.mxu1 %v1905_v26  ;;  %2623 = vmatpush3.msra.mxu0 %v1993_v33  ;;  %v2173_v45 = vpop.permute.xlu1 %2172 }
 0x195   :  { %2615 = vmatprep.subr.mxu1 %v1903_v28  ;;  %2617 = vmatprep.mubr.msk.f32.mxu1 %vm213_vm3, %v2350_v38 }
 0x196   :  { %2616 = vmatpush3.msra.mxu1 %v1903_v28  ;;  %2624 = vmatprep.mubr.msk.f32.mxu0 %vm213_vm3, %v2354_v40 }
 0x197   :  { %2618 = vmatmul.mubr.msk.f32.vlgmr.msra.gmra.mxu1 %vm213_vm3, %v2351_v41  ;;  %2627 = vmatprep.subr.mxu1 %v2085_v35 }
 0x198   :  { %2634 = vmatprep.subr.mxu0 %v2175_v42  ;;  %2625 = vmatmul.mubr.msk.f32.vlgmr.msra.gmra.mxu0 %vm213_vm3, %v2355_v43 }
 0x199   :  { %2628 = vmatpush3.msra.mxu1 %v2085_v35  ;;  %2635 = vmatpush3.msra.mxu0 %v2175_v42 }
 0x19a   :  { %2629 = vmatprep.subr.mxu1 %v2083_v39  ;;  %2631 = vmatprep.mubr.msk.f32.mxu1 %vm213_vm3, %v2358_v44 }
 0x19b   :  { %2630 = vmatpush3.msra.mxu1 %v2083_v39  ;;  %2636 = vmatprep.subr.mxu0 %v2173_v45 }
 0x19c   :  { %2632 = vmatmul.mubr.msk.f32.vlgmr.msra.gmra.mxu1 %vm213_vm3, %v2359_v46  ;;  %2637 = vmatpush3.msra.mxu0 %v2173_v45 }
 0x19d   :  { %2638 = vmatprep.mubr.msk.f32.mxu0 %vm213_vm3, %v2362_v47 }
 0x19e   :  { %2639 = vmatmul.mubr.msk.f32.vlgmr.msra.gmra.mxu0 %vm213_vm3, %v2363_v48 }
 0x209   :  { %v2500_v52 = vpop.f32.mrf.mxu0 }
 0x20b   :  { %v455_v53 = vpop.f32.mrf.mxu0 }
 0x211   :  { %v2514_v54 = vpop.f32.mrf.mxu0 }
 0x213   :  { %v635_v55 = vpop.f32.mrf.mxu0 }
 0x219   :  { %v2528_v56 = vpop.f32.mrf.mxu0 }
 0x21b   :  { %v815_v57 = vpop.f32.mrf.mxu0 }
 0x221   :  { %v2542_v58 = vpop.f32.mrf.mxu0 }
 0x223   :  { %v995_v61 = vpop.f32.mrf.mxu0 }
 0x229   :  { %v2486_v59 = vpop.f32.mrf.mxu1 }
 0x22b   :  { %v286_v60 = vpop.f32.mrf.mxu1 }
 0x22d   :  { %v2556_v1 = vpop.f32.mrf.mxu0 }
 0x22e   :  { %v2493_v62 = vpop.f32.mrf.mxu1 }
 0x22f   :  { %v373_v63 = vadd.f32 %v2493_v62, %v2486_v59  ;;  %v1175_v7 = vpop.f32.mrf.mxu0 }
 0x230   :  { %v367_v0 = vpop.f32.mrf.mxu1 }
 0x231   :  { %v465_v2 = vadd.f32 %v2500_v52, %v373_v63  ;;  %v368_v3 = vadd.f32 %v367_v0, %v286_v60 }
 0x233   :  { %v464_v4 = vadd.f32 %v455_v53, %v368_v3  ;;  %v2507_v5 = vpop.f32.mrf.mxu1 }
 0x234   :  { %v555_v6 = vadd.f32 %v2507_v5, %v465_v2 }
 0x235   :  { %v545_v8 = vpop.f32.mrf.mxu1  ;;  %v2570_v13 = vpop.f32.mrf.mxu0 }
 0x236   :  { %v645_v9 = vadd.f32 %v2514_v54, %v555_v6  ;;  %v554_v10 = vadd.f32 %v545_v8, %v464_v4 }
 0x237   :  { %v1351_v21 = vpop.f32.mrf.mxu0 }
 0x238   :  { %v644_v11 = vadd.f32 %v635_v55, %v554_v10  ;;  %v2521_v12 = vpop.f32.mrf.mxu1 }
 0x239   :  { %v735_v14 = vadd.f32 %v2521_v12, %v645_v9 }
 0x23a   :  { %v725_v15 = vpop.f32.mrf.mxu1 }
 0x23b   :  { %v825_v16 = vadd.f32 %v2528_v56, %v735_v14  ;;  %v734_v18 = vadd.f32 %v725_v15, %v644_v11 }
 0x23c   :  { %v2535_v19 = vpop.f32.mrf.mxu1 }
 0x23d   :  { %v824_v22 = vadd.f32 %v815_v57, %v734_v18  ;;  %v915_v23 = vadd.f32 %v2535_v19, %v825_v16 }
 0x23e   :  { %v905_v24 = vpop.f32.mrf.mxu1  ;;  %v2584_v27 = vpop.f32.mrf.mxu0 }
 0x23f   :  { %v1005_v25 = vadd.f32 %v2542_v58, %v915_v23  ;;  %v914_v26 = vadd.f32 %v905_v24, %v824_v22 }
 0x240   :  { %v1531_v32 = vpop.f32.mrf.mxu0 }
 0x241   :  { %v1004_v20 = vadd.f32 %v995_v61, %v914_v26  ;;  %v2549_v17 = vpop.f32.mrf.mxu1 }
 0x242   :  { %v1095_v28 = vadd.f32 %v2549_v17, %v1005_v25 }
 0x243   :  { %v1085_v29 = vpop.f32.mrf.mxu1 }
 0x244   :  { %v1185_v30 = vadd.f32 %v2556_v1, %v1095_v28  ;;  %v1094_v31 = vadd.f32 %v1085_v29, %v1004_v20 }
 0x245   :  { %v2563_v33 = vpop.f32.mrf.mxu1 }
 0x246   :  { %v1184_v34 = vadd.f32 %v1175_v7, %v1094_v31  ;;  %v1271_v35 = vadd.f32 %v2563_v33, %v1185_v30 }
 0x247   :  { %v1261_v36 = vpop.f32.mrf.mxu1  ;;  %v2598_v39 = vpop.f32.mrf.mxu0 }
 0x248   :  { %v1361_v37 = vadd.f32 %v2570_v13, %v1271_v35  ;;  %v1270_v38 = vadd.f32 %v1261_v36, %v1184_v34 }
 0x249   :  { %v1711_v44 = vpop.f32.mrf.mxu0 }
 0x24a   :  { %v1360_v40 = vadd.f32 %v1351_v21, %v1270_v38  ;;  %v2577_v41 = vpop.f32.mrf.mxu1 }
 0x24b   :  { %v1451_v42 = vadd.f32 %v2577_v41, %v1361_v37 }
 0x24c   :  { %v1441_v43 = vpop.f32.mrf.mxu1 }
 0x24d   :  { %v1541_v45 = vadd.f32 %v2584_v27, %v1451_v42  ;;  %v1450_v46 = vadd.f32 %v1441_v43, %v1360_v40 }
 0x24e   :  { %v2591_v47 = vpop.f32.mrf.mxu1 }
 0x24f   :  { %v1540_v48 = vadd.f32 %v1531_v32, %v1450_v46  ;;  %v1631_v49 = vadd.f32 %v2591_v47, %v1541_v45 }
 0x250   :  { %v1621_v50 = vpop.f32.mrf.mxu1  ;;  %v2612_v51 = vpop.f32.mrf.mxu0 }
 0x251   :  { %v1721_v52 = vadd.f32 %v2598_v39, %v1631_v49  ;;  %v1630_v53 = vadd.f32 %v1621_v50, %v1540_v48 }
 0x252   :  { %v1891_v57 = vpop.f32.mrf.mxu0 }
 0x253   :  { %v1720_v54 = vadd.f32 %v1711_v44, %v1630_v53  ;;  %v2605_v55 = vpop.f32.mrf.mxu1 }
 0x254   :  { %v1811_v56 = vadd.f32 %v2605_v55, %v1721_v52 }
 0x255   :  { %v1801_v58 = vpop.f32.mrf.mxu1 }
 0x256   :  { %v1901_v59 = vadd.f32 %v2612_v51, %v1811_v56  ;;  %v1810_v60 = vadd.f32 %v1801_v58, %v1720_v54 }
 0x257   :  { %v2619_v61 = vpop.f32.mrf.mxu1 }
 0x258   :  { %v1900_v62 = vadd.f32 %v1891_v57, %v1810_v60  ;;  %v1991_v63 = vadd.f32 %v2619_v61, %v1901_v59  ;;  %v2626_v0 = vpop.f32.mrf.mxu0 }
 0x259   :  { %v1981_v1 = vpop.f32.mrf.mxu1 }
 0x25a   :  { %v2081_v2 = vadd.f32 %v2626_v0, %v1991_v63  ;;  %v1990_v3 = vadd.f32 %v1981_v1, %v1900_v62  ;;  %v2071_v4 = vpop.f32.mrf.mxu0 }
 0x25c   :  { %v2080_v5 = vadd.f32 %v2071_v4, %v1990_v3  ;;  %v2633_v6 = vpop.f32.mrf.mxu1 }
 0x25d   :  { %v2171_v7 = vadd.f32 %v2633_v6, %v2081_v2 }
 0x25e   :  { %v2161_v8 = vpop.f32.mrf.mxu1  ;;  %v2640_v9 = vpop.f32.mrf.mxu0 }
 0x25f   :  { %v2170_v10 = vadd.f32 %v2161_v8, %v2080_v5  ;;  %v2261_v11 = vadd.f32 %v2640_v9, %v2171_v7 }
 0x260   :  { %v2251_v12 = vpop.f32.mrf.mxu0 }
 0x261   :  { %v2263_v13 = vmax.f32 %v2261_v11, 0.0  ;;  %v2260_v14 = vadd.f32 %v2251_v12, %v2170_v10 }
 0x263   :  { %2266 = vst [vmem:[%s3043_s4 + $0x10] sm:$0xff] %v2263_v13  ;;  %v2262_v15 = vmax.f32 %v2260_v14, 0.0 }
 0x265   :  { %2265 = vst [vmem:[%s3043_s4 + $0x8] sm:$0xff] %v2262_v15 }

</bundles_post_ra>
